<compile_context>
chip_gen: v7x
topology: tpu7x:2x2x1
jax: 0.10.0
libtpu: 0.0.40
codegen_flags: <defaults>
</compile_context>

<pallas_src>
import jax
import jax.numpy as jnp
from jax.experimental import pallas as pl
from jax.experimental.pallas import tpu as pltpu

_LANE = 128   # vreg lane width
_SUB = 8      # f32 sublane count


def _scale_add_kernel(beta_ref, c_ref, x_ref, o_ref):
    # beta_ref, c_ref: (1,) scalars in SMEM
    # x_ref, o_ref: (tile_rows, 128) lane-dense tiles in VMEM
    o_ref[...] = beta_ref[0] * x_ref[...] + c_ref[0]


def _scale_kernel(beta_ref, x_ref, o_ref):
    o_ref[...] = beta_ref[0] * x_ref[...]


def linear_model_forward(x, beta, c, constant, *, tile_rows=None):
    """x: (N, D) float32; beta, c: shape-(1,) float32 arrays.

    Returns y: (N,) = beta * x[:, 0] (+ c if constant).
    """
    N = x.shape[0]
    dtype = x.dtype

    # Only column 0 is used: slice it in the wrapper so the kernel's HBM
    # traffic is one column, not the whole (N, D) matrix.
    x_col = x[:, 0]                                            # (N,)

    # Pick a row tile for the (rows, 128) slab.  Per-buffer bytes at 1024 rows
    # = 1024*128*4 = 512 KiB, which is tiny even for v5e's 16 MiB / v7x's
    # smaller VMEM, while being large enough to sit near the HBM roofline.
    rows_needed = -(-N // _LANE)                               # ceil(N / 128)
    if tile_rows is None:
        if rows_needed >= 1024:
            tile_rows = 1024
        else:
            tile_rows = max(_SUB, -(-rows_needed // _SUB) * _SUB)
    tile_rows = max(_SUB, (tile_rows // _SUB) * _SUB)          # sublane aligned

    block_elems = tile_rows * _LANE
    n_blocks = -(-N // block_elems)                            # ceil
    n_pad = n_blocks * block_elems
    rows = n_pad // _LANE

    # Lane-dense slab: pad to a whole number of (tile_rows, 128) blocks.
    x_slab = jnp.pad(x_col, (0, n_pad - N)).reshape(rows, _LANE)

    in_tile = pl.BlockSpec((tile_rows, _LANE), lambda i: (i, 0))
    out_tile = pl.BlockSpec((tile_rows, _LANE), lambda i: (i, 0))
    cparams = pltpu.CompilerParams(dimension_semantics=("parallel",))

    if constant:
        kernel = _scale_add_kernel
        in_specs = [
            pl.BlockSpec(memory_space=pltpu.SMEM),             # beta
            pl.BlockSpec(memory_space=pltpu.SMEM),             # c
            in_tile,                                           # x slab
        ]
        args = (beta, c, x_slab)
    else:
        kernel = _scale_kernel
        in_specs = [
            pl.BlockSpec(memory_space=pltpu.SMEM),             # beta
            in_tile,                                           # x slab
        ]
        args = (beta, x_slab)

    out = pl.pallas_call(
        kernel,
        out_shape=jax.ShapeDtypeStruct((rows, _LANE), dtype),
        grid=(n_blocks,),
        in_specs=in_specs,
        out_specs=out_tile,
        compiler_params=cparams,
    )(*args)

    return out.reshape(n_pad)[:N]


if __name__ == "__main__":
    key = jax.random.PRNGKey(0)
    kx, kb, kc, kx2 = jax.random.split(key, 4)

    # Deterministic "parameters" mirroring torch.rand(1) init (uniform [0,1)).
    beta = jax.random.uniform(kb, (1,), dtype=jnp.float32)
    c = jax.random.uniform(kc, (1,), dtype=jnp.float32)

    # 1) Small shapes consistent with the module's forward (x indexed as x[:, 0]).
    N, D = 8, 16
    x = jax.random.normal(kx, (N, D), dtype=jnp.float32)

    y = linear_model_forward(x, beta, c, constant=True)
    y = jax.block_until_ready(y)
    y_ref = beta[0] * x[:, 0] + c[0]
    assert y.shape == (N,)
    assert jnp.allclose(y, y_ref, atol=1e-6, rtol=1e-6)

    # 2) Slightly larger ragged N with a small tile to exercise the multi-block
    #    grid + padding path (and constant=False branch).
    N2, D2 = 2500, 16
    x2 = jax.random.normal(kx2, (N2, D2), dtype=jnp.float32)

    y2 = linear_model_forward(x2, beta, c, constant=False, tile_rows=8)
    y2 = jax.block_until_ready(y2)
    y2_ref = beta[0] * x2[:, 0]
    assert y2.shape == (N2,)
    assert jnp.allclose(y2, y2_ref, atol=1e-6, rtol=1e-6)

    print("KERNEL_OK")
</pallas_src>

<mosaic_0001>
module attributes {stable_mosaic.version = 11 : i64} {
  func.func @_scale_add_kernel(%arg0: i32, %arg1: memref<1xf32, #tpu.memory_space<smem>>, %arg2: memref<1xf32, #tpu.memory_space<smem>>, %arg3: memref<8x128xf32, #tpu.memory_space<vmem>>, %arg4: memref<8x128xf32, #tpu.memory_space<vmem>>) attributes {dimension_semantics = [#tpu.dimension_semantics<parallel>], iteration_bounds = array<i64: 1>, scalar_prefetch = 0 : i64, scratch_operands = 0 : i64, tpu.core_type = #tpu.core_type<tc>, window_params = [{transform_indices = @transform_0, window_bounds = array<i64: 1>}, {transform_indices = @transform_1, window_bounds = array<i64: 1>}, {transform_indices = @transform_2, window_bounds = array<i64: 8, 128>}, {transform_indices = @transform_3, window_bounds = array<i64: 8, 128>}]} {
    %c0 = arith.constant 0 : index
    %0 = memref.load %arg1[%c0] : memref<1xf32, #tpu.memory_space<smem>>
    %c0_0 = arith.constant 0 : index
    %c0_1 = arith.constant 0 : index
    %1 = vector.load %arg3[%c0_0, %c0_1] : memref<8x128xf32, #tpu.memory_space<vmem>>, vector<8x128xf32>
    %2 = vector.broadcast %0 : f32 to vector<8x128xf32>
    %3 = arith.mulf %2, %1 : vector<8x128xf32>
    %c0_2 = arith.constant 0 : index
    %4 = memref.load %arg2[%c0_2] : memref<1xf32, #tpu.memory_space<smem>>
    %5 = vector.broadcast %4 : f32 to vector<8x128xf32>
    %6 = arith.addf %3, %5 : vector<8x128xf32>
    %c0_3 = arith.constant 0 : index
    %c0_4 = arith.constant 0 : index
    %7 = vector.load %arg4[%c0_3, %c0_4] : memref<8x128xf32, #tpu.memory_space<vmem>>, vector<8x128xf32>
    tpu.vector_store %arg4[%c0_3, %c0_4], %6 {strides = array<i32>} : memref<8x128xf32, #tpu.memory_space<vmem>>, vector<8x128xf32>,
    return
  }
  func.func @transform_0(%arg0: i32) -> i32 {
    %c0_i32 = arith.constant 0 : i32
    %c0_i32_0 = arith.constant 0 : i32
    return %c0_i32 : i32
  }
  func.func @transform_1(%arg0: i32) -> i32 {
    %c0_i32 = arith.constant 0 : i32
    %c0_i32_0 = arith.constant 0 : i32
    return %c0_i32 : i32
  }
  func.func @transform_2(%arg0: i32) -> (i32, i32) {
    %c0_i32 = arith.constant 0 : i32
    %c0_i32_0 = arith.constant 0 : i32
    return %arg0, %c0_i32 : i32, i32
  }
  func.func @transform_3(%arg0: i32) -> (i32, i32) {
    %c0_i32 = arith.constant 0 : i32
    %c0_i32_0 = arith.constant 0 : i32
    return %arg0, %c0_i32 : i32, i32
  }
}

</mosaic_0001>

<bundles_post_ra>
// kernel: tpu_custom_call.1
= control target key start
LH: loop header
LB: loop body
LE: loop exit
PB: predicated region body
PF: predicated region fallthrough
CT: control target
= control target key end

     0   :  { %10 = vsyncpa [#allocation5], 0  ;;  %s154_s0 = inlined_call_operand.<no memory space> [shape: f32[1], index: 0, kind: input, shape index: {}]   ;;  %s155_s1 = inlined_call_operand.<no memory space> [shape: f32[1], index: 1, kind: input, shape index: {}]   ;;  %s156_s2 = inlined_call_operand.hbm [shape: f32[8,128], index: 2, kind: input, shape index: {}]   ;;  %s157_s3 = inlined_call_operand.hbm [shape: f32[8,128], index: 3, kind: output, shape index: {}]  }
   0x1   :  { %11 = vsyncpa [#allocation6], 0  ;;  %s102_s12 = smov [#allocation4]   ;;  %s54_s16 = scalar_lea.hbm %s156_s2, 128 }
   0x2   :  { %s22_s13 = sshll.u32 %s102_s12, 4  ;;  %p55_p0 = scmp.ne.s32.totalorder %s156_s2, %s54_s16  ;;  %s23_s13 = int_to_ptr.vmem [resolvable:$true] %s22_s13 }
   0x3   :  { %p58_p1 = scmp.lt.u32.totalorder %s54_s16, %s156_s2 }
   0x5   :  { %p60_p2 = pnand %p58_p1, %p55_p0 }
   0x7   :  { %63 = shalt.err (!%p60_p2)
}
   0x8   :  { %s64_s21 = scalar_lea.vmem %s23_s13, 128  ;;  %p69_p4 = scmp.lt.s32.totalorder %s23_s13, %s23_s13 }
   0x9   :  { %p65_p3 = scmp.ne.s32.totalorder %s23_s13, %s64_s21  ;;  %p70_p5 = scmp.lt.s32.totalorder %s64_s21, %s64_s21 }
   0xb   :  { %p71_p6 = por %p70_p5, %p69_p4 }
   0xd   :  { %p72_p7 = pnand %p71_p6, %p65_p3 }
   0xf   :  { %75 = shalt.err (!%p72_p7)
}
  0x10   :  { %25 = dma.hbm_to_vmem [thread:$0]  %s156_s2, 128, %s23_s13, [#allocation5]  }
  0x11   :  { %98 = dma.done.wait [#allocation5], 128  }
  0x12   :  { %99 = vsyncadd [#allocation5], 4294967168  ;;  %v31_v0 = vstv %s154_s0  ;;  %v30_v1 = vld [vmem:[#allocation4] sm:$0xff]  ;;  %v34_v2 = vstv %s155_s1  ;;  %s103_s28 = smov [#allocation7]  }
  0x13   :  { %s43_s29 = sshll.u32 %s103_s28, 4  ;;  %v32_v3 = vmul.f32 %v31_v0, %v30_v1  ;;  %s44_s29 = int_to_ptr.vmem [resolvable:$true] %s43_s29 }
  0x14   :  { %s76_s30 = scalar_lea.vmem %s44_s29, 128  ;;  %p81_p9 = scmp.lt.s32.totalorder %s44_s29, %s44_s29 }
  0x15   :  { %v35_v4 = vadd.f32 %v34_v2, %v32_v3  ;;  %p77_p8 = scmp.ne.s32.totalorder %s44_s29, %s76_s30  ;;  %p82_p10 = scmp.lt.s32.totalorder %s76_s30, %s76_s30 }
  0x17   :  { %36 = vst [vmem:[#allocation7] sm:$0xff] %v35_v4  ;;  %p83_p11 = por %p82_p10, %p81_p9 }
  0x19   :  { %p84_p12 = pnand %p83_p11, %p77_p8 }
  0x1b   :  { %87 = shalt.err (!%p84_p12)
}
  0x1c   :  { %s88_s4 = scalar_lea.hbm %s157_s3, 128 }
  0x1d   :  { %p89_p13 = scmp.ne.s32.totalorder %s157_s3, %s88_s4  ;;  %p92_p0 = scmp.lt.u32.totalorder %s88_s4, %s157_s3 }
  0x1f   :  { %p94_p1 = pnand %p92_p0, %p89_p13 }
  0x21   :  { %97 = shalt.err (!%p94_p1)
}
  0x22   :  { %46 = dma.vmem_to_hbm [thread:$0]  %s44_s29, 128, %s157_s3, [#allocation6]  }
  0x23   :  { %100 = dma.done.wait [#allocation6], 128  }
  0x24   :  { %101 = vsyncadd [#allocation6], 4294967168 }
  0x25   :  { %50 = vsyncpa [#allocation5], 1 }
  0x26   :  { %51 = vsyncpa [#allocation6], 1 }

</bundles_post_ra>
